<compile_context>
chip_gen: v7x
topology: tpu7x:2x2x1
jax: 0.10.0
libtpu: 0.0.40
codegen_flags: <defaults>
</compile_context>

<pallas_src>
import math

import jax
import jax.numpy as jnp
import numpy as np
from jax.experimental import pallas as pl
from jax.experimental.pallas import tpu as pltpu

_LANES = 128
_MAX_PACKED_COLS = 512      # cap on pack*D so the block-diag weight stays tiny


def _sublane_align(itemsize):
    return 8 if itemsize >= 4 else (16 if itemsize == 2 else 32)


def _cdiv(a, b):
    return -(-a // b)


# ---------------------------------------------------------------------------
# Kernels
# ---------------------------------------------------------------------------
def _cross_kernel_rowsum(x0_ref, x_ref, w_ref, b_ref, o_ref):
    """Unpacked path (feature dim D >= 128 sits directly on the lane axis).
    Row dot = lane reduction accumulated in f32; elementwise in input dtype."""
    x0 = x0_ref[...]                                        # (TB, D)
    x = x_ref[...]                                          # (TB, D)
    w = w_ref[...]                                          # (1,  D)
    b = b_ref[...]                                          # (1,  D)
    xw = jnp.sum(x * w, axis=-1, keepdims=True, dtype=jnp.float32)  # (TB, 1)
    xw = xw.astype(x0.dtype)
    o_ref[...] = (x0 * xw + b + x).astype(o_ref.dtype)


def _cross_kernel_mxu(x0_ref, x_ref, wblk_ref, b_ref, o_ref):
    """Packed / lane-dense path: `pack` logical rows of width D per lane-dense
    row.  The per-logical-row dot is one block-diagonal (cols x cols) matmul
    on the MXU (vector-extended slot, co-issues with the VPU epilogue)."""
    x0 = x0_ref[...]                                        # (TB, cols)
    x = x_ref[...]                                          # (TB, cols)
    b = b_ref[...]                                          # (1,  cols)
    xw = jnp.dot(x, wblk_ref[...],
                 preferred_element_type=jnp.float32,
                 precision=jax.lax.Precision.HIGHEST)       # (TB, cols), f32 acc
    xw = xw.astype(x0.dtype)
    o_ref[...] = (x0 * xw + b + x).astype(o_ref.dtype)


# ---------------------------------------------------------------------------
# Wrapper helpers
# ---------------------------------------------------------------------------
def _block_diag_weights(weights, pack, dtype):
    """Wblk[j, i] = w[j % D] * (j // D == i // D), shape (pack*D, pack*D)."""
    d = weights.shape[0]
    blk = jnp.broadcast_to(weights.astype(jnp.float32)[:, None], (d, d))
    wblk = jnp.kron(jnp.eye(pack, dtype=jnp.float32), blk)
    return wblk.astype(dtype)


def _pick_block_rows(n_rows, n_cols, itemsize,
                     tile_budget_bytes=2 << 20,
                     vmem_budget_bytes=16 << 20):
    """Largest batch tile such that each streamed tile is ~2 MiB and the six
    live tile buffers (x0 / x / out, each double-buffered) fit the budget."""
    align = _sublane_align(itemsize)
    row_bytes = n_cols * itemsize
    cap_tile = max(align, tile_budget_bytes // row_bytes)
    cap_vmem = max(align, vmem_budget_bytes // (6 * row_bytes))
    tb = min(n_rows, cap_tile, cap_vmem)
    if tb < n_rows:
        tb = max(align, (tb // align) * align)   # non-final tiles: sublane-aligned
        tb = min(tb, n_rows)
    return tb


# ---------------------------------------------------------------------------
# Public entry point
# ---------------------------------------------------------------------------
def cross_forward(x0, x, weights, bias, *, block_rows=None,
                  small_problem_bytes=1 << 20, force_pallas=False):
    """Pallas implementation of Cross.forward.

    x0, x   : (B, D)
    weights : (D,)
    bias    : (D,)
    returns : (B, D)
    """
    assert x0.shape == x.shape and x0.ndim == 2
    B, D = x.shape
    dtype = x.dtype
    itemsize = jnp.dtype(dtype).itemsize
    align = _sublane_align(itemsize)

    # ---- small-problem fast path: kernel launch cost would dominate --------
    streamed_bytes = 3 * B * D * itemsize
    if not force_pallas and streamed_bytes < small_problem_bytes:
        return cross_reference_collapsed(x0, x, weights, bias).astype(dtype)

    # ---- lane-dense packing for narrow D ------------------------------------
    pack = 1
    if D < _LANES:
        lcm = (D * _LANES) // math.gcd(D, _LANES)
        if lcm <= _MAX_PACKED_COLS:
            pack = lcm // D

    if pack > 1:
        # Pad B so that (a) it divides by pack and (b) packed rows are a
        # multiple of the sublane alignment (all tiles fully aligned).
        pad_to = pack * align
        b_pad = (-B) % pad_to
        x0p = jnp.pad(x0, ((0, b_pad), (0, 0))) if b_pad else x0
        xp = jnp.pad(x, ((0, b_pad), (0, 0))) if b_pad else x
        rows, cols = (B + b_pad) // pack, D * pack
        x0v = x0p.reshape(rows, cols)
        xv = xp.reshape(rows, cols)
        wv = _block_diag_weights(weights, pack, dtype)              # (cols, cols)
        bv = jnp.tile(bias.astype(dtype), pack).reshape(1, cols)
        kernel = _cross_kernel_mxu
        w_spec = pl.BlockSpec((cols, cols), lambda i: (0, 0))       # resident
    else:
        rows, cols = B, D
        x0v, xv = x0, x
        wv = weights.astype(dtype).reshape(1, D)
        bv = bias.astype(dtype).reshape(1, D)
        kernel = _cross_kernel_rowsum
        w_spec = pl.BlockSpec((1, cols), lambda i: (0, 0))          # resident

    # ---- batch-tile selection ------------------------------------------------
    if block_rows is not None:
        tb = max(1, min(int(block_rows), rows))
        if tb < rows:                      # non-final tiles must be sublane-aligned
            tb = max(align, (tb // align) * align)
    else:
        tb = _pick_block_rows(rows, cols, itemsize)
        # Force >= 2 grid steps when possible so the "parallel" batch axis can
        # shard across v7x's two TensorCores (negligible cost on 1-TC chips).
        if tb >= rows and rows >= 2 * align:
            tb = min(rows, _cdiv(_cdiv(rows, 2), align) * align)

    grid = (pl.cdiv(rows, tb),)

    # ---- VMEM limit derived from the actual buffers (safe for v7x 64 MiB) ---
    tile_bytes = tb * cols * itemsize
    resident_bytes = 2 * (wv.size + bv.size) * itemsize
    vmem_limit = 3 * 2 * tile_bytes + resident_bytes + (4 << 20)
    vmem_limit = int(min(max(vmem_limit, 16 << 20), 48 << 20))

    out = pl.pallas_call(
        kernel,
        out_shape=jax.ShapeDtypeStruct((rows, cols), dtype),
        grid_spec=pl.GridSpec(
            grid=grid,
            in_specs=[
                pl.BlockSpec((tb, cols), lambda i: (i, 0)),   # x0 tile
                pl.BlockSpec((tb, cols), lambda i: (i, 0)),   # x tile
                w_spec,                                        # weights (resident)
                pl.BlockSpec((1, cols), lambda i: (0, 0)),     # bias (resident)
            ],
            out_specs=pl.BlockSpec((tb, cols), lambda i: (i, 0)),
        ),
        compiler_params=pltpu.CompilerParams(
            dimension_semantics=("parallel",),   # batch tiles fully independent
            vmem_limit_bytes=vmem_limit,
        ),
    )(x0v, xv, wv, bv)

    if pack > 1:
        out = out.reshape(-1, D)[:B]
    return out


# ---------------------------------------------------------------------------
# References
# ---------------------------------------------------------------------------
def cross_reference(x0, x, weights, bias):
    """Pure-JAX reference mirroring the PyTorch module op-for-op."""
    x0xl = jnp.einsum("bi,bj->bij", x0, x)
    return jnp.tensordot(x0xl, weights, axes=[[-1], [0]]) + bias + x


def cross_reference_collapsed(x0, x, weights, bias):
    """Algebraically identical collapsed form (f32 row-dot accumulation)."""
    xw = jnp.sum(x * weights[None, :], axis=-1, keepdims=True,
                 dtype=jnp.float32).astype(x.dtype)
    return x0 * xw + bias + x


# ---------------------------------------------------------------------------
# Self-test
# ---------------------------------------------------------------------------
if __name__ == "__main__":
    def make(key, b, d, dtype=jnp.float32):
        k0, k1, kw = jax.random.split(key, 3)
        x0 = jax.random.normal(k0, (b, d), dtype=jnp.float32).astype(dtype)
        x = jax.random.normal(k1, (b, d), dtype=jnp.float32).astype(dtype)
        w = (jax.random.normal(kw, (d,), dtype=jnp.float32)
             * np.sqrt(2.0 / d)).astype(dtype)
        bias = jnp.zeros((d,), dtype=dtype)
        return x0, x, w, bias

    keys = jax.random.split(jax.random.PRNGKey(0), 8)

    def check(out, x0, x, w, b, rtol=1e-5, atol=1e-5):
        ref = cross_reference(x0.astype(jnp.float32), x.astype(jnp.float32),
                              w.astype(jnp.float32), b.astype(jnp.float32))
        np.testing.assert_allclose(np.asarray(out, dtype=np.float32),
                                   np.asarray(ref), rtol=rtol, atol=atol)

    # 1. Shipped config (B=8, D=32): small-problem fast path (pure JAX).
    x0, x, w, b = make(keys[0], 8, 32)
    out = jax.block_until_ready(cross_forward(x0, x, w, b))
    check(out, x0, x, w, b)

    # 2. Same shape forced through the packed block-diagonal MXU kernel.
    out = jax.block_until_ready(cross_forward(x0, x, w, b, force_pallas=True))
    check(out, x0, x, w, b)

    # 3. Packed path with a multi-step "parallel" grid (B=512, D=32 -> 128x128).
    x0, x, w, b = make(keys[1], 512, 32)
    out = jax.block_until_ready(cross_forward(x0, x, w, b, force_pallas=True))
    check(out, x0, x, w, b)

    # 4. B not a multiple of pack (B=10, D=32): padded packed path, output sliced.
    x0, x, w, b = make(keys[2], 10, 32)
    out = jax.block_until_ready(cross_forward(x0, x, w, b, force_pallas=True))
    check(out, x0, x, w, b)

    # 5. 128 % D != 0 (D=48 -> pack=8, cols=384): lane-dense via lcm packing.
    x0, x, w, b = make(keys[3], 24, 48)
    out = jax.block_until_ready(cross_forward(x0, x, w, b, force_pallas=True))
    check(out, x0, x, w, b)

    # 6. Unpacked lane-aligned path (D=128) with user block_rows rounded to the
    #    sublane alignment (18 -> 16) and a partial last tile.
    x0, x, w, b = make(keys[4], 40, 128)
    out = jax.block_until_ready(
        cross_forward(x0, x, w, b, block_rows=18, force_pallas=True))
    check(out, x0, x, w, b)

    # 7. bf16 packed path: elementwise stays bf16, row-dot accumulates in f32.
    x0, x, w, b = make(keys[5], 64, 32, dtype=jnp.bfloat16)
    out = jax.block_until_ready(cross_forward(x0, x, w, b, force_pallas=True))
    check(out, x0, x, w, b, rtol=5e-2, atol=5e-2)

    print("KERNEL_OK")
</pallas_src>

<mosaic_0001>
module attributes {stable_mosaic.version = 11 : i64} {
  func.func @_cross_kernel_mxu(%arg0: i32, %arg1: memref<8x128xf32, #tpu.memory_space<vmem>>, %arg2: memref<8x128xf32, #tpu.memory_space<vmem>>, %arg3: memref<128x128xf32, #tpu.memory_space<vmem>>, %arg4: memref<1x128xf32, #tpu.memory_space<vmem>>, %arg5: memref<8x128xf32, #tpu.memory_space<vmem>>) attributes {dimension_semantics = [#tpu.dimension_semantics<parallel>], iteration_bounds = array<i64: 1>, scalar_prefetch = 0 : i64, scratch_operands = 0 : i64, tpu.core_type = #tpu.core_type<tc>, window_params = [{transform_indices = @transform_0, window_bounds = array<i64: 8, 128>}, {transform_indices = @transform_1, window_bounds = array<i64: 8, 128>}, {pipeline_mode = #tpu.pipeline_mode<synchronous>, transform_indices = @transform_2, window_bounds = array<i64: 128, 128>}, {pipeline_mode = #tpu.pipeline_mode<synchronous>, transform_indices = @transform_3, window_bounds = array<i64: 1, 128>}, {transform_indices = @transform_4, window_bounds = array<i64: 8, 128>}]} {
    %c0 = arith.constant 0 : index
    %c0_0 = arith.constant 0 : index
    %0 = vector.load %arg1[%c0, %c0_0] : memref<8x128xf32, #tpu.memory_space<vmem>>, vector<8x128xf32>
    %c0_1 = arith.constant 0 : index
    %c0_2 = arith.constant 0 : index
    %1 = vector.load %arg2[%c0_1, %c0_2] : memref<8x128xf32, #tpu.memory_space<vmem>>, vector<8x128xf32>
    %c0_3 = arith.constant 0 : index
    %c0_4 = arith.constant 0 : index
    %2 = vector.load %arg4[%c0_3, %c0_4] : memref<1x128xf32, #tpu.memory_space<vmem>>, vector<1x128xf32>
    %c0_5 = arith.constant 0 : index
    %c0_6 = arith.constant 0 : index
    %3 = vector.load %arg3[%c0_5, %c0_6] : memref<128x128xf32, #tpu.memory_space<vmem>>, vector<128x128xf32>
    %cst = arith.constant dense<0.000000e+00> : vector<8x128xf32>
    %4 = tpu.matmul %1, %3, %cst {dimension_numbers = #tpu.dot_dimension_numbers<[1], [0], [0], [1], [0, 0, 1, 1], [], []>, precision = #tpu.contract_precision<fp32>} : vector<8x128xf32>, vector<128x128xf32>, vector<8x128xf32> -> vector<8x128xf32>
    %5 = arith.mulf %0, %4 : vector<8x128xf32>
    %6 = vector.broadcast %2 : vector<1x128xf32> to vector<8x128xf32>
    %7 = arith.addf %5, %6 : vector<8x128xf32>
    %8 = arith.addf %7, %1 : vector<8x128xf32>
    %c0_7 = arith.constant 0 : index
    %c0_8 = arith.constant 0 : index
    %9 = vector.load %arg5[%c0_7, %c0_8] : memref<8x128xf32, #tpu.memory_space<vmem>>, vector<8x128xf32>
    tpu.vector_store %arg5[%c0_7, %c0_8], %8 {strides = array<i32>} : memref<8x128xf32, #tpu.memory_space<vmem>>, vector<8x128xf32>,
    return
  }
  func.func @transform_0(%arg0: i32) -> (i32, i32) {
    %c0_i32 = arith.constant 0 : i32
    %c0_i32_0 = arith.constant 0 : i32
    return %arg0, %c0_i32 : i32, i32
  }
  func.func @transform_1(%arg0: i32) -> (i32, i32) {
    %c0_i32 = arith.constant 0 : i32
    %c0_i32_0 = arith.constant 0 : i32
    return %arg0, %c0_i32 : i32, i32
  }
  func.func @transform_2(%arg0: i32) -> (i32, i32) {
    %c0_i32 = arith.constant 0 : i32
    %c0_i32_0 = arith.constant 0 : i32
    %c0_i32_1 = arith.constant 0 : i32
    return %c0_i32, %c0_i32_0 : i32, i32
  }
  func.func @transform_3(%arg0: i32) -> (i32, i32) {
    %c0_i32 = arith.constant 0 : i32
    %c0_i32_0 = arith.constant 0 : i32
    %c0_i32_1 = arith.constant 0 : i32
    return %c0_i32, %c0_i32_0 : i32, i32
  }
  func.func @transform_4(%arg0: i32) -> (i32, i32) {
    %c0_i32 = arith.constant 0 : i32
    %c0_i32_0 = arith.constant 0 : i32
    return %arg0, %c0_i32 : i32, i32
  }
}

</mosaic_0001>

<bundles_post_ra>
// kernel: tpu_custom_call.1
= control target key start
LH: loop header
LB: loop body
LE: loop exit
PB: predicated region body
PF: predicated region fallthrough
CT: control target
= control target key end

     0   :  { %9 = vsyncpa [#allocation3], 0  ;;  %s1647_s0 = inlined_call_operand.hbm [shape: f32[8,128], index: 0, kind: input, shape index: {}]   ;;  %s1648_s1 = inlined_call_operand.hbm [shape: f32[8,128], index: 1, kind: input, shape index: {}]   ;;  %s1649_s2 = inlined_call_operand.hbm [shape: f32[128,128], index: 2, kind: input, shape index: {}]   ;;  %s1650_s3 = inlined_call_operand.vmem [shape: f32[1,128], index: 3, kind: input, shape index: {}]   ;;  %s1651_s4 = inlined_call_operand.hbm [shape: f32[8,128], index: 4, kind: output, shape index: {}]  }
   0x1   :  { %10 = vsyncpa [#allocation6], 0 }
   0x2   :  { %11 = vsyncpa [#allocation4], 0  ;;  %s1310_s15 = smov [#allocation5]   ;;  %s1311_s17 = smov [#allocation2]  }
   0x3   :  { %s28_s16 = sshll.u32 %s1310_s15, 4  ;;  %s18_s18 = sshll.u32 %s1311_s17, 4  ;;  %s29_s16 = int_to_ptr.vmem [resolvable:$true] %s28_s16  ;;  %s19_s18 = int_to_ptr.vmem [resolvable:$true] %s18_s18 }
   0x4   :  { %s1216_s21 = scalar_lea.hbm %s1648_s1, 128 }
   0x5   :  { %p1217_p0 = scmp.ne.s32.totalorder %s1648_s1, %s1216_s21  ;;  %p1220_p1 = scmp.lt.u32.totalorder %s1216_s21, %s1648_s1 }
   0x7   :  { %p1222_p2 = pnand %p1220_p1, %p1217_p0 }
   0x9   :  { %1225 = shalt.err (!%p1222_p2)
}
   0xa   :  { %s1226_s26 = scalar_lea.vmem %s29_s16, 128  ;;  %p1231_p4 = scmp.lt.s32.totalorder %s29_s16, %s29_s16 }
   0xb   :  { %p1227_p3 = scmp.ne.s32.totalorder %s29_s16, %s1226_s26  ;;  %p1232_p5 = scmp.lt.s32.totalorder %s1226_s26, %s1226_s26 }
   0xd   :  { %p1233_p6 = por %p1232_p5, %p1231_p4 }
   0xf   :  { %p1234_p7 = pnand %p1233_p6, %p1227_p3 }
  0x11   :  { %1237 = shalt.err (!%p1234_p7)
}
  0x12   :  { %31 = dma.hbm_to_vmem [thread:$0]  %s1648_s1, 128, %s29_s16, [#allocation6]  }
  0x13   :  { %s1238_s5 = scalar_lea.hbm %s1647_s0, 128 }
  0x14   :  { %p1239_p8 = scmp.ne.s32.totalorder %s1647_s0, %s1238_s5  ;;  %p1242_p9 = scmp.lt.u32.totalorder %s1238_s5, %s1647_s0 }
  0x16   :  { %p1244_p10 = pnand %p1242_p9, %p1239_p8 }
  0x18   :  { %1247 = shalt.err (!%p1244_p10)
}
  0x19   :  { %s1248_s10 = scalar_lea.vmem %s19_s18, 128  ;;  %p1253_p12 = scmp.lt.s32.totalorder %s19_s18, %s19_s18 }
  0x1a   :  { %p1249_p11 = scmp.ne.s32.totalorder %s19_s18, %s1248_s10  ;;  %p1254_p13 = scmp.lt.s32.totalorder %s1248_s10, %s1248_s10 }
  0x1c   :  { %p1255_p0 = por %p1254_p13, %p1253_p12 }
  0x1e   :  { %p1256_p1 = pnand %p1255_p0, %p1249_p11 }
  0x20   :  { %1259 = shalt.err (!%p1256_p1)
}
  0x21   :  { %21 = dma.hbm_to_vmem [thread:$0]  %s1647_s0, 128, %s19_s18, [#allocation3]  }
  0x22   :  { %s1312_s12 = smov [#allocation7]   ;;  %s1260_s16 = scalar_lea.hbm %s1649_s2, 2048 }
  0x23   :  { %s37_s13 = sshll.u32 %s1312_s12, 4  ;;  %p1261_p2 = scmp.ne.s32.totalorder %s1649_s2, %s1260_s16  ;;  %s38_s13 = int_to_ptr.vmem [resolvable:$true] %s37_s13 }
  0x24   :  { %p1264_p3 = scmp.lt.u32.totalorder %s1260_s16, %s1649_s2 }
  0x26   :  { %p1266_p4 = pnand %p1264_p3, %p1261_p2 }
  0x28   :  { %1269 = shalt.err (!%p1266_p4)
}
  0x29   :  { %s1270_s22 = scalar_lea.vmem %s38_s13, 2048  ;;  %p1275_p6 = scmp.lt.s32.totalorder %s38_s13, %s38_s13 }
  0x2a   :  { %p1271_p5 = scmp.ne.s32.totalorder %s38_s13, %s1270_s22  ;;  %p1276_p7 = scmp.lt.s32.totalorder %s1270_s22, %s1270_s22 }
  0x2c   :  { %p1277_p8 = por %p1276_p7, %p1275_p6 }
  0x2e   :  { %p1278_p9 = pnand %p1277_p8, %p1271_p5 }
  0x30   :  { %1281 = shalt.err (!%p1278_p9)
}
  0x31   :  { %s1313_s0 = smov 128   ;;  %s1314_s18 = smov 8  }
  0x32   :  { %43 = dma.hbm_to_vmem [thread:$0]  %s1649_s2, 2048, %s38_s13, [#allocation6], %s1313_s0, %s1313_s0, %s1314_s18  }
  0x33   :  { %1304 = dma.done.wait [#allocation3], 128  }
  0x34   :  { %1305 = vsyncadd [#allocation3], 4294967168 }
  0x35   :  { %1306 = dma.done.wait [#allocation6], 2176  }
  0x36   :  { %1307 = vsyncadd [#allocation6], 4294965120  ;;  %v1315_v0 = vmov 0.0|0.0   ;;  %vm1316_vm0 = vmmov 0   ;;  %v1317_v1 = vmov 0.0   ;;  %v58_v2 = vld [vmem:[#allocation7] sm:$0xff] }
  0x37   :  { %1054 = vmatprep.subr.bf16.mxu1 %v1315_v0  ;;  %1126 = vmatprep.subr.bf16.mxu0 %v1315_v0  ;;  %v59_v3 = vld [vmem:[#allocation7 + $0x8] sm:$0xff]  ;;  %v60_v4 = vld [vmem:[#allocation7 + $0x10] sm:$0xff]  ;;  %v75_v5 = vand.u32 4294901760, %v58_v2  ;;  %v61_v7 = vld [vmem:[#allocation7 + $0x18] sm:$0xff]  ;;  %s1318_s26 = smov [#allocation8]  }
  0x38   :  { %876 = vmatprep.mubr.msk.f32.mxu1 %vm1316_vm0, %v1317_v1  ;;  %981 = vmatprep.mubr.msk.f32.mxu0 %vm1316_vm0, %v1317_v1  ;;  %v78_v6 = vand.u32 4294901760, %v59_v3  ;;  %v81_v8 = vand.u32 4294901760, %v60_v4  ;;  %v84_v9 = vand.u32 4294901760, %v61_v7  ;;  %v62_v10 = vld [vmem:[#allocation7 + $0x20] sm:$0xff]  ;;  %v63_v11 = vld [vmem:[#allocation7 + $0x28] sm:$0xff]  ;;  %v64_v16 = vld [vmem:[#allocation7 + $0x30] sm:$0xff] }
  0x39   :  { %v87_v14 = vand.u32 4294901760, %v62_v10  ;;  %v90_v15 = vand.u32 4294901760, %v63_v11  ;;  %v65_v17 = vld [vmem:[#allocation7 + $0x38] sm:$0xff]  ;;  %v93_v19 = vand.u32 4294901760, %v64_v16  ;;  %v1400_v21 = vld [vmem:[#allocation7 + $0x40] sm:$0xff]  ;;  %v1402_v22 = vld [vmem:[#allocation7 + $0x48] sm:$0xff]  ;;  %v1418_v29 = vsub.f32 %v58_v2, %v75_v5 }
  0x3a   :  { %v1386_v12 = vpack.c.bf16 %v78_v6, %v75_v5  ;;  %v1390_v13 = vpack.c.bf16 %v84_v9, %v81_v8  ;;  %v96_v20 = vand.u32 4294901760, %v65_v17  ;;  %v99_v24 = vand.u32 4294901760, %v1400_v21  ;;  %v1410_v26 = vld [vmem:[#allocation5] sm:$0xff]  ;;  %v1414_v27 = vld [vmem:[#allocation7 + $0x50] sm:$0xff]  ;;  %v1431_v35 = vld [vmem:[#allocation7 + $0x60] sm:$0xff]  ;;  %s731_s27 = sshll.u32 %s1318_s26, 4  ;;  %s732_s27 = int_to_ptr.vmem [resolvable:$true] %s731_s27 }
  0x3b   :  { %v1396_v18 = vpack.c.bf16 %v90_v15, %v87_v14  ;;  %v102_v25 = vand.u32 4294901760, %v1402_v22  ;;  %v1416_v28 = vld [vmem:[#allocation7 + $0x58] sm:$0xff]  ;;  %v1421_v30 = vand.u32 4294901760, %v1410_v26  ;;  %v1423_v31 = vsub.f32 %v59_v3, %v78_v6  ;;  %v1435_v36 = vld [vmem:[#allocation7 + $0x68] sm:$0xff]  ;;  %v1455_v43 = vld [vmem:[#allocation7 + $0x70] sm:$0xff]  ;;  %s1282_s28 = scalar_lea.vmem %s732_s27, 128  ;;  %p1287_p11 = scmp.lt.s32.totalorder %s732_s27, %s732_s27 }
  0x3c   :  { %1056 = vmatpush3.bf16.msra.mxu1 %v1386_v12  ;;  %1128 = vmatpush3.bf16.msra.mxu0 %v1386_v12  ;;  %v1406_v23 = vpack.c.bf16 %v96_v20, %v93_v19  ;;  %v105_v33 = vand.u32 4294901760, %v1414_v27  ;;  %v108_v34 = vand.u32 4294901760, %v1416_v28  ;;  %v1437_v37 = vsub.f32 %v60_v4, %v81_v8  ;;  %v1457_v44 = vld [vmem:[#allocation7 + $0x78] sm:$0xff]  ;;  %p1283_p10 = scmp.ne.s32.totalorder %s732_s27, %s1282_s28  ;;  %p1288_p12 = scmp.lt.s32.totalorder %s1282_s28, %s1282_s28 }
  0x3d   :  { %1057 = vmatprep.subr.bf16.mxu1 %v1315_v0  ;;  %1129 = vmatprep.subr.bf16.mxu0 %v1315_v0  ;;  %v1427_v32 = vpack.c.bf16 %v102_v25, %v99_v24  ;;  %v1439_v38 = vsub.f32 %v61_v7, %v84_v9  ;;  %v111_v39 = vand.u32 4294901760, %v1431_v35  ;;  %v1444_v40 = vsub.f32 %v1410_v26, %v1421_v30 }
  0x3e   :  { %v1452_v41 = vpack.c.bf16 %v108_v34, %v105_v33  ;;  %v114_v42 = vand.u32 4294901760, %v1435_v36  ;;  %v168_v45 = vand.u32 4294901760, %v1418_v29  ;;  %v175_v46 = vand.u32 4294901760, %v1423_v31  ;;  %p1289_p13 = por %p1288_p12, %p1287_p11 }
  0x3f   :  { %v1463_v47 = vsub.f32 %v62_v10, %v87_v14  ;;  %v1465_v48 = vsub.f32 %v63_v11, %v90_v15  ;;  %v117_v49 = vand.u32 4294901760, %v1455_v43  ;;  %v120_v50 = vand.u32 4294901760, %v1457_v44 }
  0x40   :  { %1059 = vmatpush3.bf16.msra.mxu1 %v1390_v13  ;;  %1131 = vmatpush3.bf16.msra.mxu0 %v1390_v13  ;;  %v157_v51 = vand.u32 4294901760, %v1444_v40  ;;  %v182_v52 = vand.u32 4294901760, %v1437_v37  ;;  %v1477_v53 = vpack.c.bf16 %v114_v42, %v111_v39  ;;  %v169_v54 = vsub.f32 %v1418_v29, %v168_v45  ;;  %p1290_p0 = pnand %p1289_p13, %p1283_p10 }
  0x41   :  { %1060 = vmatprep.subr.bf16.mxu1 %v1315_v0  ;;  %1132 = vmatprep.subr.bf16.mxu0 %v1315_v0  ;;  %v176_v55 = vsub.f32 %v1423_v31, %v175_v46  ;;  %v189_v56 = vand.u32 4294901760, %v1439_v38  ;;  %v1484_v57 = vsub.f32 %v64_v16, %v93_v19  ;;  %v1486_v58 = vsub.f32 %v65_v17, %v96_v20 }
  0x42   :  { %v158_v59 = vsub.f32 %v1444_v40, %v157_v51  ;;  %v183_v60 = vsub.f32 %v1437_v37, %v182_v52  ;;  %v196_v61 = vand.u32 4294901760, %v1463_v47  ;;  %v203_v62 = vand.u32 4294901760, %v1465_v48 }
  0x43   :  { %v1498_v63 = vpack.c.bf16 %v120_v50, %v117_v49  ;;  %v170_v2 = vand.u32 4294901760, %v169_v54  ;;  %v177_v3 = vand.u32 4294901760, %v176_v55  ;;  %v190_v4 = vsub.f32 %v1439_v38, %v189_v56 }
  0x44   :  { %1062 = vmatpush3.bf16.msra.mxu1 %v1396_v18  ;;  %1134 = vmatpush3.bf16.msra.mxu0 %v1396_v18  ;;  %v1504_v5 = vsub.f32 %v1400_v21, %v99_v24  ;;  %v1507_v6 = vsub.f32 %v1402_v22, %v102_v25  ;;  %v1151_v7 = vpack.c.bf16 %v175_v46, %v168_v45  ;;  %v159_v8 = vand.u32 4294901760, %v158_v59 }
  0x45   :  { %1063 = vmatprep.subr.bf16.mxu1 %v1315_v0  ;;  %1135 = vmatprep.subr.bf16.mxu0 %v1315_v0  ;;  %v184_v9 = vand.u32 4294901760, %v183_v60  ;;  %v197_v10 = vsub.f32 %v1463_v47, %v196_v61  ;;  %v204_v11 = vsub.f32 %v1465_v48, %v203_v62  ;;  %v1079_v14 = vpack.c.bf16 %v177_v3, %v170_v2 }
  0x46   :  { %v191_v15 = vand.u32 4294901760, %v190_v4  ;;  %v210_v16 = vand.u32 4294901760, %v1484_v57  ;;  %v217_v17 = vand.u32 4294901760, %v1486_v58  ;;  %v1520_v19 = vsub.f32 %v1414_v27, %v105_v33 }
  0x47   :  { %v1525_v20 = vsub.f32 %v1416_v28, %v108_v34  ;;  %v1154_v21 = vpack.c.bf16 %v189_v56, %v182_v52  ;;  %v198_v22 = vand.u32 4294901760, %v197_v10  ;;  %v205_v24 = vand.u32 4294901760, %v204_v11 }
  0x48   :  { %1065 = vmatpush3.bf16.msra.mxu1 %v1406_v23  ;;  %1137 = vmatpush3.bf16.msra.mxu0 %v1406_v23  ;;  %v224_v25 = vand.u32 4294901760, %v1504_v5  ;;  %v1082_v45 = vpack.c.bf16 %v191_v15, %v184_v9  ;;  %v211_v46 = vsub.f32 %v1484_v57, %v210_v16  ;;  %v218_v27 = vsub.f32 %v1486_v58, %v217_v17 }
  0x49   :  { %1066 = vmatprep.subr.bf16.mxu1 %v1315_v0  ;;  %1138 = vmatprep.subr.bf16.mxu0 %v1315_v0  ;;  %v231_v33 = vand.u32 4294901760, %v1507_v6  ;;  %v1536_v28 = vsub.f32 %v1431_v35, %v111_v39  ;;  %v1541_v34 = vsub.f32 %v1435_v36, %v114_v42  ;;  %v1157_v52 = vpack.c.bf16 %v203_v62, %v196_v61 }
  0x4a   :  { %v225_v54 = vsub.f32 %v1504_v5, %v224_v25  ;;  %v238_v55 = vand.u32 4294901760, %v1520_v19  ;;  %v212_v35 = vand.u32 4294901760, %v211_v46  ;;  %v219_v39 = vand.u32 4294901760, %v218_v27 }
  0x4b   :  { %v232_v56 = vsub.f32 %v1507_v6, %v231_v33  ;;  %v245_v36 = vand.u32 4294901760, %v1525_v20  ;;  %v1556_v42 = vsub.f32 %v1455_v43, %v117_v49  ;;  %v1561_v59 = vsub.f32 %v1457_v44, %v120_v50 }
  0x4c   :  { %1068 = vmatpush3.bf16.msra.mxu1 %v1427_v32  ;;  %1140 = vmatpush3.bf16.msra.mxu0 %v1427_v32  ;;  %v1160_v60 = vpack.c.bf16 %v217_v17, %v210_v16  ;;  %v226_v61 = vand.u32 4294901760, %v225_v54  ;;  %v239_v62 = vsub.f32 %v1520_v19, %v238_v55  ;;  %v252_v2 = vand.u32 4294901760, %v1536_v28 }
  0x4d   :  { %1069 = vmatprep.subr.bf16.mxu1 %v1315_v0  ;;  %1141 = vmatprep.subr.bf16.mxu0 %v1315_v0  ;;  %v1088_v3 = vpack.c.bf16 %v219_v39, %v212_v35  ;;  %v233_v4 = vand.u32 4294901760, %v232_v56  ;;  %v259_v43 = vand.u32 4294901760, %v1541_v34  ;;  %v1163_v44 = vpack.c.bf16 %v231_v33, %v224_v25 }
  0x4e   :  { %v240_v49 = vand.u32 4294901760, %v239_v62  ;;  %v253_v50 = vsub.f32 %v1536_v28, %v252_v2  ;;  %v1166_v15 = vpack.c.bf16 %v245_v36, %v238_v55  ;;  %v1106_v54 = vpack.c.bf16 %v1439_v38, %v1437_v37 }
  0x4f   :  { %v1091_v9 = vpack.c.bf16 %v233_v4, %v226_v61  ;;  %v260_v11 = vsub.f32 %v1541_v34, %v259_v43 }
  0x50   :  { %1071 = vmatpush3.bf16.msra.mxu1 %v1452_v41  ;;  %1143 = vmatpush3.bf16.msra.mxu0 %v1452_v41  ;;  %v254_v16 = vand.u32 4294901760, %v253_v50 }
  0x51   :  { %1072 = vmatprep.subr.bf16.mxu1 %v1315_v0  ;;  %1144 = vmatprep.subr.bf16.mxu0 %v1315_v0 }
  0x54   :  { %1074 = vmatpush3.bf16.msra.mxu1 %v1477_v53  ;;  %1146 = vmatpush3.bf16.msra.mxu0 %v1477_v53 }
  0x55   :  { %1075 = vmatprep.subr.bf16.mxu1 %v1315_v0  ;;  %1147 = vmatprep.subr.bf16.mxu0 %v1315_v0 }
  0x58   :  { %1077 = vmatpush3.bf16.msra.mxu1 %v1498_v63  ;;  %1149 = vmatpush3.bf16.msra.mxu0 %v1498_v63 }
  0x59   :  { %1078 = vmatprep.subr.bf16.mxu1 %v1315_v0  ;;  %1150 = vmatprep.subr.bf16.mxu0 %v1315_v0 }
  0x5b   :  { %877 = vmatmul.mubr.f32.vlgmr.msra.gmra.mrb[0].mxu1 %v159_v8  ;;  %982 = vmatmul.mubr.f32.vlgmr.msra.gmra.mrb[0].mxu0 %v157_v51  ;;  %v1085_v51 = vpack.c.bf16 %v205_v24, %v198_v22  ;;  %v266_v8 = vand.u32 4294901760, %v1556_v42 }
  0x5c   :  { %1080 = vmatpush3.bf16.msra.mxu1 %v1079_v14  ;;  %1152 = vmatpush3.bf16.msra.mxu0 %v1151_v7  ;;  %v246_v7 = vsub.f32 %v1525_v20, %v245_v36  ;;  %v273_v14 = vand.u32 4294901760, %v1561_v59 }
  0x5d   :  { %1081 = vmatprep.subr.bf16.mxu1 %v1315_v0  ;;  %1153 = vmatprep.subr.bf16.mxu0 %v1315_v0  ;;  %v267_v22 = vsub.f32 %v1556_v42, %v266_v8 }
  0x5e   :  { %911 = vmatprep.mubr.msk.f32.mxu1 %vm1316_vm0, %v1317_v1  ;;  %1016 = vmatprep.mubr.msk.f32.mxu0 %vm1316_vm0, %v1317_v1  ;;  %v247_v10 = vand.u32 4294901760, %v246_v7  ;;  %v274_v24 = vsub.f32 %v1561_v59, %v273_v14 }
  0x5f   :  { %v268_v46 = vand.u32 4294901760, %v267_v22 }
  0x60   :  { %1083 = vmatpush3.bf16.msra.mxu1 %v1082_v45  ;;  %1155 = vmatpush3.bf16.msra.mxu0 %v1154_v21  ;;  %v1094_v17 = vpack.c.bf16 %v247_v10, %v240_v49  ;;  %v261_v21 = vand.u32 4294901760, %v260_v11  ;;  %v1169_v45 = vpack.c.bf16 %v259_v43, %v252_v2  ;;  %v275_v27 = vand.u32 4294901760, %v274_v24 }
  0x61   :  { %1084 = vmatprep.subr.bf16.mxu1 %v1315_v0  ;;  %1156 = vmatprep.subr.bf16.mxu0 %v1315_v0 }
  0x62   :  { %v1097_v25 = vpack.c.bf16 %v261_v21, %v254_v16  ;;  %v1100_v33 = vpack.c.bf16 %v275_v27, %v268_v46 }
  0x64   :  { %1086 = vmatpush3.bf16.msra.mxu1 %v1085_v51  ;;  %1158 = vmatpush3.bf16.msra.mxu0 %v1157_v52  ;;  %v1172_v51 = vpack.c.bf16 %v273_v14, %v266_v8  ;;  %v1103_v52 = vpack.c.bf16 %v1423_v31, %v1418_v29  ;;  %v1109_v29 = vpack.c.bf16 %v1465_v48, %v1463_v47  ;;  %v741_v48 = vld [vmem:[%s1650_s3] ss:$0 sm:$0xff] }
  0x65   :  { %1087 = vmatprep.subr.bf16.mxu1 %v1315_v0  ;;  %1159 = vmatprep.subr.bf16.mxu0 %v1315_v0 }
  0x68   :  { %1089 = vmatpush3.bf16.msra.mxu1 %v1088_v3  ;;  %1161 = vmatpush3.bf16.msra.mxu0 %v1160_v60 }
  0x69   :  { %1090 = vmatprep.subr.bf16.mxu1 %v1315_v0  ;;  %1162 = vmatprep.subr.bf16.mxu0 %v1315_v0 }
  0x6c   :  { %1092 = vmatpush3.bf16.msra.mxu1 %v1091_v9  ;;  %1164 = vmatpush3.bf16.msra.mxu0 %v1163_v44 }
  0x6d   :  { %1093 = vmatprep.subr.bf16.mxu1 %v1315_v0  ;;  %1165 = vmatprep.subr.bf16.mxu0 %v1315_v0 }
  0x70   :  { %1095 = vmatpush3.bf16.msra.mxu1 %v1094_v17  ;;  %1167 = vmatpush3.bf16.msra.mxu0 %v1166_v15 }
  0x71   :  { %1096 = vmatprep.subr.bf16.mxu1 %v1315_v0  ;;  %1168 = vmatprep.subr.bf16.mxu0 %v1315_v0 }
  0x74   :  { %1098 = vmatpush3.bf16.msra.mxu1 %v1097_v25  ;;  %1170 = vmatpush3.bf16.msra.mxu0 %v1169_v45 }
  0x75   :  { %1099 = vmatprep.subr.bf16.mxu1 %v1315_v0  ;;  %1171 = vmatprep.subr.bf16.mxu0 %v1315_v0 }
  0x78   :  { %1101 = vmatpush3.bf16.msra.mxu1 %v1100_v33  ;;  %1173 = vmatpush3.bf16.msra.mxu0 %v1172_v51 }
  0x79   :  { %1102 = vmatprep.subr.bf16.mxu1 %v1315_v0  ;;  %1174 = vmatprep.subr.bf16.mxu0 %v1315_v0 }
  0x7b   :  { %912 = vmatmul.mubr.f32.vlgmr.msra.gmra.mrb[0].mxu1 %v1421_v30  ;;  %1017 = vmatmul.mubr.f32.vlgmr.msra.gmra.mrb[0].mxu0 %v1421_v30 }
  0x7c   :  { %1104 = vmatpush3.bf16.msra.mxu1 %v1103_v52  ;;  %1176 = vmatpush3.bf16.msra.mxu0 %v1386_v12  ;;  %v1112_v12 = vpack.c.bf16 %v1486_v58, %v1484_v57 }
  0x7d   :  { %1105 = vmatprep.subr.bf16.mxu1 %v1315_v0  ;;  %1177 = vmatprep.subr.bf16.mxu0 %v1315_v0 }
  0x7e   :  { %946 = vmatprep.mubr.msk.f32.mxu1 %vm1316_vm0, %v1317_v1  ;;  %1051 = vmatprep.mubr.msk.f32.mxu0 %vm1316_vm0, %v1317_v1  ;;  %v1115_v1 = vpack.c.bf16 %v1507_v6, %v1504_v5 }
  0x80   :  { %1107 = vmatpush3.bf16.msra.mxu1 %v1106_v54  ;;  %1179 = vmatpush3.bf16.msra.mxu0 %v1390_v13  ;;  %v1118_v13 = vpack.c.bf16 %v1525_v20, %v1520_v19 }
  0x81   :  { %1108 = vmatprep.subr.bf16.mxu1 %v1315_v0  ;;  %1180 = vmatprep.subr.bf16.mxu0 %v1315_v0 }
  0x84   :  { %1110 = vmatpush3.bf16.msra.mxu1 %v1109_v29  ;;  %1182 = vmatpush3.bf16.msra.mxu0 %v1396_v18  ;;  %v1121_v18 = vpack.c.bf16 %v1541_v34, %v1536_v28 }
  0x85   :  { %1111 = vmatprep.subr.bf16.mxu1 %v1315_v0  ;;  %1183 = vmatprep.subr.bf16.mxu0 %v1315_v0 }
  0x88   :  { %1113 = vmatpush3.bf16.msra.mxu1 %v1112_v12  ;;  %1185 = vmatpush3.bf16.msra.mxu0 %v1406_v23  ;;  %v1124_v23 = vpack.c.bf16 %v1561_v59, %v1556_v42 }
  0x89   :  { %1114 = vmatprep.subr.bf16.mxu1 %v1315_v0  ;;  %1186 = vmatprep.subr.bf16.mxu0 %v1315_v0 }
  0x8c   :  { %1116 = vmatpush3.bf16.msra.mxu1 %v1115_v1  ;;  %1188 = vmatpush3.bf16.msra.mxu0 %v1427_v32  ;;  %v55_v32 = vld [vmem:[#allocation2] sm:$0xff] }
  0x8d   :  { %1117 = vmatprep.subr.bf16.mxu1 %v1315_v0  ;;  %1189 = vmatprep.subr.bf16.mxu0 %v1315_v0 }
  0x90   :  { %1119 = vmatpush3.bf16.msra.mxu1 %v1118_v13  ;;  %1191 = vmatpush3.bf16.msra.mxu0 %v1452_v41 }
  0x91   :  { %1120 = vmatprep.subr.bf16.mxu1 %v1315_v0  ;;  %1192 = vmatprep.subr.bf16.mxu0 %v1315_v0 }
  0x94   :  { %1122 = vmatpush3.bf16.msra.mxu1 %v1121_v18  ;;  %1194 = vmatpush3.bf16.msra.mxu0 %v1477_v53 }
  0x95   :  { %1123 = vmatprep.subr.bf16.mxu1 %v1315_v0  ;;  %1195 = vmatprep.subr.bf16.mxu0 %v1315_v0 }
  0x98   :  { %1125 = vmatpush3.bf16.msra.mxu1 %v1124_v23  ;;  %1197 = vmatpush3.bf16.msra.mxu0 %v1498_v63 }
  0x9b   :  { %947 = vmatmul.mubr.f32.vlgmr.msra.gmra.mrb[0].mxu1 %v1444_v40  ;;  %1052 = vmatmul.mubr.f32.vlgmr.msra.gmra.mrb[0].mxu0 %v1421_v30 }
 0x16e   :  { %v416_v31 = vpop.f32.mrb[0].mxu1  ;;  %v711_v37 = vpop.f32.mrb[0].mxu0 }
 0x16f   :  { %v1198_v38 = vadd.f32 %v711_v37, %v416_v31  ;;  %v948_v41 = vpop.f32.mrb[1].mxu1  ;;  %v1053_v47 = vpop.f32.mrb[1].mxu0 }
 0x171   :  { %v715_v53 = vmul.f32 %v1198_v38, %v55_v32 }
 0x173   :  { %v722_v0 = vadd.f32 %v741_v48, %v715_v53 }
 0x175   :  { %v723_v57 = vadd.f32 %v722_v0, %v1410_v26 }
 0x177   :  { %724 = vst [vmem:[#allocation8] sm:$0xff] %v723_v57 }
 0x178   :  { %1293 = shalt.err (!%p1290_p0)
}
 0x179   :  { %s1294_s5 = scalar_lea.hbm %s1651_s4, 128 }
 0x17a   :  { %p1295_p1 = scmp.ne.s32.totalorder %s1651_s4, %s1294_s5  ;;  %p1298_p2 = scmp.lt.u32.totalorder %s1294_s5, %s1651_s4 }
 0x17c   :  { %p1300_p3 = pnand %p1298_p2, %p1295_p1 }
 0x17e   :  { %1303 = shalt.err (!%p1300_p3)
}
 0x17f   :  { %734 = dma.vmem_to_hbm [thread:$0]  %s732_s27, 128, %s1651_s4, [#allocation4]  }
 0x180   :  { %1308 = dma.done.wait [#allocation4], 128  }
 0x181   :  { %1309 = vsyncadd [#allocation4], 4294967168 }
 0x182   :  { %738 = vsyncpa [#allocation3], 1 }
 0x183   :  { %739 = vsyncpa [#allocation6], 1 }
 0x184   :  { %740 = vsyncpa [#allocation4], 1 }

</bundles_post_ra>
